<compile_context>
chip_gen: v7x
topology: tpu7x:2x2x1
jax: 0.10.0
libtpu: 0.0.40
codegen_flags: <defaults>
</compile_context>

<pallas_src>
import functools

import jax
import jax.numpy as jnp
from jax import lax
from jax.experimental import pallas as pl
from jax.experimental.pallas import tpu as pltpu


def _cdiv(a, b):
    return -(-a // b)


def _round_down(a, b):
    return (a // b) * b


# ----------------------------------------------------------------------------
# Kernel 1: global min/max reduction (ch_axis == -1)
#   input viewed as (rows, 128); grid = (num_splits [parallel], blocks [arb])
# ----------------------------------------------------------------------------
def _global_minmax_kernel(x_ref, min_ref, max_ref, min_sc, max_sc, *,
                          n_valid, block_rows, acc_rows, blocks_per_split,
                          n_row_blocks):
    p = pl.program_id(0)                 # megacore split
    j = pl.program_id(1)                 # reduction step within split
    j_last = pl.num_programs(1) - 1
    dt = x_ref.dtype
    pos_fill = jnp.asarray(jnp.inf, dtype=dt)
    neg_fill = jnp.asarray(-jnp.inf, dtype=dt)

    @pl.when(j == 0)
    def _():
        min_sc[...] = jnp.full_like(min_sc, jnp.inf)
        max_sc[...] = jnp.full_like(max_sc, -jnp.inf)

    blk = x_ref[...]                     # (block_rows, 128), native dtype
    # actual row-block index this step covers (same clamp as the index_map;
    # duplicates are harmless because min/max are idempotent)
    rb = jnp.minimum(p * blocks_per_split + j, n_row_blocks - 1)

    n_slices = block_rows // acc_rows
    need_mask = (n_valid % (block_rows * 128)) != 0      # static (python)

    def fold(masked):
        mn = min_sc[...]
        mx = max_sc[...]
        if masked:
            row_io = lax.broadcasted_iota(jnp.int32, (acc_rows, 128), 0)
            lane_io = lax.broadcasted_iota(jnp.int32, (acc_rows, 128), 1)
            full_rows = n_valid // 128
            rem_lanes = n_valid % 128
        for s in range(n_slices):
            sl = blk[s * acc_rows:(s + 1) * acc_rows, :]   # (acc_rows, 128)
            if masked:
                grow = rb * block_rows + s * acc_rows + row_io
                valid = grow < full_rows
                if rem_lanes:
                    valid = jnp.logical_or(
                        valid,
                        jnp.logical_and(grow == full_rows,
                                        lane_io < rem_lanes))
                mn = jnp.minimum(mn, jnp.where(valid, sl, pos_fill))
                mx = jnp.maximum(mx, jnp.where(valid, sl, neg_fill))
            else:
                mn = jnp.minimum(mn, sl)
                mx = jnp.maximum(mx, sl)
        min_sc[...] = mn
        max_sc[...] = mx

    if need_mask:
        @pl.when(rb != n_row_blocks - 1)
        def _():
            fold(False)

        @pl.when(rb == n_row_blocks - 1)
        def _():
            fold(True)
    else:
        fold(False)

    # single cross-lane/sublane reduce + single output store, last step only
    @pl.when(j == j_last)
    def _():
        min_ref[...] = jnp.min(min_sc[...], keepdims=True).astype(jnp.float32)
        max_ref[...] = jnp.max(max_sc[...], keepdims=True).astype(jnp.float32)


def global_aminmax(x, *, block_rows_max=1024):
    """(min, max) scalars (f32) over all elements of x, single HBM pass."""
    flat = jnp.ravel(x)                                  # free view
    if not jnp.issubdtype(flat.dtype, jnp.floating) or flat.dtype == jnp.float64:
        flat = flat.astype(jnp.float32)
    n = flat.shape[0]
    lane = 128
    rem = n % lane
    if rem:
        # Only when numel isn't a multiple of 128: pad so the flat buffer can
        # be viewed as (rows, 128).  Pad values are dead (masked in-kernel).
        flat = jnp.pad(flat, (0, lane - rem))
    rows = flat.shape[0] // lane
    x2d = flat.reshape(rows, lane)                       # free view

    if rows <= 8:
        block_rows = rows                                # full-dim block
    else:
        block_rows = min(block_rows_max, _round_down(rows, 8))
    acc_rows = block_rows if block_rows <= 8 else (
        64 if block_rows % 64 == 0 else 8)
    n_row_blocks = _cdiv(rows, block_rows)
    num_splits = 2 if n_row_blocks >= 2 else 1           # both TCs on v7x
    bps = _cdiv(n_row_blocks, num_splits)

    kernel = functools.partial(
        _global_minmax_kernel, n_valid=n, block_rows=block_rows,
        acc_rows=acc_rows, blocks_per_split=bps, n_row_blocks=n_row_blocks)

    out_shape = (jax.ShapeDtypeStruct((num_splits, 1), jnp.float32),
                 jax.ShapeDtypeStruct((num_splits, 1), jnp.float32))
    mn, mx = pl.pallas_call(
        kernel,
        out_shape=out_shape,
        grid_spec=pltpu.PrefetchScalarGridSpec(
            num_scalar_prefetch=0,
            grid=(num_splits, bps),
            in_specs=[pl.BlockSpec(
                (block_rows, lane),
                lambda p, j: (jnp.minimum(p * bps + j, n_row_blocks - 1), 0))],
            out_specs=[pl.BlockSpec((1, 1), lambda p, j: (p, 0)),
                       pl.BlockSpec((1, 1), lambda p, j: (p, 0))],
            scratch_shapes=[pltpu.VMEM((acc_rows, lane), x2d.dtype),
                            pltpu.VMEM((acc_rows, lane), x2d.dtype)],
        ),
        compiler_params=pltpu.CompilerParams(
            dimension_semantics=("parallel", "arbitrary")),
    )(x2d)
    # combine the per-core partials (tiny)
    return jnp.min(mn), jnp.max(mx)


# ----------------------------------------------------------------------------
# Kernel 2: per-channel min/max reduction (ch_axis != -1)
#   input viewed (for free) as (pre, C, post); grid =
#   (channel blocks [parallel], pre [arb], post tiles [arb])
# ----------------------------------------------------------------------------
def _per_channel_minmax_kernel(y_ref, min_ref, max_ref, min_sc, max_sc, *,
                               post, post_tile, lane_w):
    n_i = pl.program_id(1)
    pb = pl.program_id(2)
    n_last = pl.num_programs(1) - 1
    pb_last = pl.num_programs(2) - 1
    dt = y_ref.dtype
    pos_fill = jnp.asarray(jnp.inf, dtype=dt)
    neg_fill = jnp.asarray(-jnp.inf, dtype=dt)

    @pl.when(jnp.logical_and(n_i == 0, pb == 0))
    def _():
        min_sc[...] = jnp.full_like(min_sc, jnp.inf)
        max_sc[...] = jnp.full_like(max_sc, -jnp.inf)

    blk = y_ref[...]                     # (c_blk, post_tile), native dtype
    c_blk = blk.shape[0]
    n_slices = post_tile // lane_w
    ragged = (post % post_tile) != 0     # static (python)

    def fold(masked):
        mn = min_sc[...]
        mx = max_sc[...]
        if masked:
            lane_io = lax.broadcasted_iota(jnp.int32, (c_blk, lane_w), 1)
        for k in range(n_slices):
            sl = blk[:, k * lane_w:(k + 1) * lane_w]     # (c_blk, lane_w)
            if masked:
                pos_idx = pb * post_tile + k * lane_w + lane_io
                valid = pos_idx < post
                mn = jnp.minimum(mn, jnp.where(valid, sl, pos_fill))
                mx = jnp.maximum(mx, jnp.where(valid, sl, neg_fill))
            else:
                mn = jnp.minimum(mn, sl)
                mx = jnp.maximum(mx, sl)
        min_sc[...] = mn
        max_sc[...] = mx

    if ragged:
        @pl.when(pb != pb_last)
        def _():
            fold(False)

        @pl.when(pb == pb_last)
        def _():
            fold(True)
    else:
        fold(False)

    # one cross-lane reduce + one output store per channel block, at the end
    @pl.when(jnp.logical_and(n_i == n_last, pb == pb_last))
    def _():
        min_ref[...] = jnp.min(min_sc[...], axis=1,
                               keepdims=True).astype(jnp.float32)
        max_ref[...] = jnp.max(max_sc[...], axis=1,
                               keepdims=True).astype(jnp.float32)


def per_channel_aminmax(x, ch_axis, *, post_tile_max=4096, c_blk_max=64):
    """Equivalent of torch._aminmax(_transform_to_ch_axis(x, ch_axis), 1)."""
    if ch_axis < 0:
        ch_axis += x.ndim
    shape = x.shape
    pre = 1
    for d in shape[:ch_axis]:
        pre *= d
    c = shape[ch_axis]
    post = 1
    for d in shape[ch_axis + 1:]:
        post *= d
    # free view: no transpose, no flatten copy
    y = x.reshape(pre, c, post)
    if not jnp.issubdtype(y.dtype, jnp.floating) or y.dtype == jnp.float64:
        y = y.astype(jnp.float32)

    # channel tiling (multiple of 8, never larger than C); raggedness on the
    # channel axis only produces garbage output rows that get sliced off
    if c <= 8:
        c_blk = c
    else:
        c_blk = min(c_blk_max, _round_down(c, 8))
    c_blocks = _cdiv(c, c_blk)

    # feature (post) tiling: 128-lane multiples, ragged tail masked in-kernel
    # TODO(synk): ch_axis == last dim gives post == 1 (lane width 1) -- correct
    # but slow; a dedicated channels-on-lanes kernel would be needed for speed.
    if post < 128:
        post_tile = post
        lane_w = post
    else:
        post_tile = min(post_tile_max, _round_down(post, 128))
        lane_w = 128
    post_blocks = _cdiv(post, post_tile)

    kernel = functools.partial(_per_channel_minmax_kernel,
                               post=post, post_tile=post_tile, lane_w=lane_w)

    c_out = c_blocks * c_blk
    out_shape = (jax.ShapeDtypeStruct((c_out, 1), jnp.float32),
                 jax.ShapeDtypeStruct((c_out, 1), jnp.float32))
    mn, mx = pl.pallas_call(
        kernel,
        out_shape=out_shape,
        grid_spec=pltpu.PrefetchScalarGridSpec(
            num_scalar_prefetch=0,
            grid=(c_blocks, pre, post_blocks),
            in_specs=[pl.BlockSpec((None, c_blk, post_tile),
                                   lambda cb, n, pb: (n, cb, pb))],
            out_specs=[pl.BlockSpec((c_blk, 1), lambda cb, n, pb: (cb, 0)),
                       pl.BlockSpec((c_blk, 1), lambda cb, n, pb: (cb, 0))],
            scratch_shapes=[pltpu.VMEM((c_blk, lane_w), y.dtype),
                            pltpu.VMEM((c_blk, lane_w), y.dtype)],
        ),
        compiler_params=pltpu.CompilerParams(
            dimension_semantics=("parallel", "arbitrary", "arbitrary")),
    )(y)
    return mn[:c, 0], mx[:c, 0]


# ----------------------------------------------------------------------------
# MinMaxObserver (JAX / Pallas version)
# ----------------------------------------------------------------------------
class MinMaxObserver:
    """Calculate minmax of the whole calibration dataset (Pallas-backed)."""

    def __init__(self, bit=8, symmetric=False, ch_axis=-1):
        self.bit = bit
        self.symmetric = symmetric
        self.ch_axis = ch_axis
        self.eps = jnp.asarray([jnp.finfo(jnp.float32).eps], jnp.float32)
        if self.symmetric:
            self.quant_min = -2 ** (self.bit - 1) + 1
            self.quant_max = 2 ** (self.bit - 1) - 1
        else:
            self.quant_min = 0
            self.quant_max = 2 ** self.bit - 1
        self.min_val = jnp.asarray(float("inf"), jnp.float32)
        self.max_val = jnp.asarray(float("-inf"), jnp.float32)

    def forward(self, x_orig, observation_mask=None, seq_pos=-1):
        """Records the minimum and maximum of x (mirrors the reference: the
        stored buffers are overwritten with the current batch's aminmax)."""
        if x_orig.size == 0:
            return x_orig
        x = jnp.asarray(x_orig)
        if observation_mask is not None:
            # TODO(synk): remove_padding needs data-dependent (dynamic) output
            # shapes (boolean advanced indexing); not expressible in a static
            # Pallas grid — mask=None path only.
            raise NotImplementedError("observation_mask not supported")
        if self.ch_axis == -1:
            min_val_cur, max_val_cur = global_aminmax(x)
        else:
            min_val_cur, max_val_cur = per_channel_aminmax(x, self.ch_axis)
        self.min_val = min_val_cur
        self.max_val = max_val_cur
        return (min_val_cur, max_val_cur)

    __call__ = forward

    def calculate_qparams(self, min_val, max_val):
        quant_min, quant_max = self.quant_min, self.quant_max
        min_val_neg = jnp.minimum(min_val, jnp.zeros_like(min_val))
        max_val_pos = jnp.maximum(max_val, jnp.zeros_like(max_val))
        if self.symmetric:
            max_val_pos = jnp.maximum(-min_val_neg, max_val_pos)
            scale = max_val_pos / (float(quant_max - quant_min) / 2)
            scale = jnp.maximum(scale, self.eps)
            zero_point = jnp.zeros(min_val_neg.shape, jnp.int32)
        else:
            scale = (max_val_pos - min_val_neg) / float(quant_max - quant_min)
            scale = jnp.maximum(scale, self.eps)
            zero_point = quant_min - jnp.round(min_val_neg / scale)
            zero_point = jnp.clip(zero_point, quant_min, quant_max)
        return scale, zero_point


# ----------------------------------------------------------------------------
if __name__ == "__main__":
    key = jax.random.PRNGKey(0)
    k1, k2, k3, k4, k5 = jax.random.split(key, 5)

    # ---- global (ch_axis == -1): clean, ragged-row-block, lane-padded ------
    obs_g = MinMaxObserver(bit=8, symmetric=False, ch_axis=-1)
    for shp, kk in (((2, 4, 16, 16), k1),   # exact tiles
                    ((2, 4, 16, 20), k2),   # ragged row blocks, 2 splits
                    ((3, 5, 7, 9), k3)):    # numel not multiple of 128
        x = jax.random.normal(kk, shp, dtype=jnp.float32)
        mn_g, mx_g = obs_g(x)
        jax.block_until_ready((mn_g, mx_g))
        assert jnp.allclose(mn_g, jnp.min(x)), (shp, mn_g, jnp.min(x))
        assert jnp.allclose(mx_g, jnp.max(x)), (shp, mx_g, jnp.max(x))

    # ---- per-channel --------------------------------------------------------
    def _ref_aminmax(x, ax):
        perm = list(range(x.ndim))
        perm[0], perm[ax] = perm[ax], perm[0]
        y = jnp.transpose(x, perm).reshape(x.shape[ax], -1)
        return jnp.min(y, axis=1), jnp.max(y, axis=1)

    cases = (((2, 4, 16, 16), 1, k1),    # NCHW, small C (full-dim block)
             ((4, 12, 10, 10), 1, k4),   # ragged channel blocks, post < 128
             ((12, 300), 0, k5),         # weight-like, ragged post tiles
             ((2, 3, 4, 9), 3, k2))      # channel == last axis (degenerate)
    for shp, ax, kk in cases:
        x = jax.random.normal(kk, shp, dtype=jnp.float32)
        obs_c = MinMaxObserver(bit=8, symmetric=True, ch_axis=ax)
        mn_c, mx_c = obs_c(x)
        jax.block_until_ready((mn_c, mx_c))
        rmn, rmx = _ref_aminmax(x, ax)
        assert mn_c.shape == (shp[ax],) and mx_c.shape == (shp[ax],)
        assert jnp.allclose(mn_c, rmn), (shp, ax)
        assert jnp.allclose(mx_c, rmx), (shp, ax)

    # qparams (plain JAX glue, mirrors calculate_qparams)
    x = jax.random.normal(k1, (2, 4, 16, 16), dtype=jnp.float32)
    s, zp = obs_g.calculate_qparams(*obs_g(x))
    jax.block_until_ready((s, zp))

    print("KERNEL_OK")
</pallas_src>

<mosaic_0001>
module attributes {stable_mosaic.version = 11 : i64} {
  func.func @_global_minmax_kernel(%arg0: i32, %arg1: i32, %arg2: memref<16x128xf32, #tpu.memory_space<vmem>>, %arg3: memref<1x1xf32, #tpu.memory_space<vmem>>, %arg4: memref<1x1xf32, #tpu.memory_space<vmem>>, %arg5: memref<8x128xf32, #tpu.memory_space<vmem>>, %arg6: memref<8x128xf32, #tpu.memory_space<vmem>>) attributes {dimension_semantics = [#tpu.dimension_semantics<parallel>, #tpu.dimension_semantics<arbitrary>], iteration_bounds = array<i64: 1, 1>, scalar_prefetch = 0 : i64, scratch_operands = 2 : i64, tpu.core_type = #tpu.core_type<tc>, window_params = [{transform_indices = @transform_0, window_bounds = array<i64: 16, 128>}, {transform_indices = @transform_1, window_bounds = array<i64: 1, 1>}, {transform_indices = @transform_2, window_bounds = array<i64: 1, 1>}]} {
    %c0_i32 = arith.constant 0 : i32
    %0 = arith.cmpi eq, %arg1, %c0_i32 : i32
    %1 = arith.extui %0 : i1 to i32
    %c0_i32_0 = arith.constant 0 : i32
    %2 = arith.cmpi ne, %1, %c0_i32_0 : i32
    scf.if %2 {
      %cst = arith.constant 0x7F800000 : f32
      %17 = vector.broadcast %cst : f32 to vector<8x128xf32>
      %c0_12 = arith.constant 0 : index
      %c0_13 = arith.constant 0 : index
      %18 = vector.load %arg5[%c0_12, %c0_13] : memref<8x128xf32, #tpu.memory_space<vmem>>, vector<8x128xf32>
      tpu.vector_store %arg5[%c0_12, %c0_13], %17 {strides = array<i32>} : memref<8x128xf32, #tpu.memory_space<vmem>>, vector<8x128xf32>,
      %cst_14 = arith.constant 0xFF800000 : f32
      %19 = vector.broadcast %cst_14 : f32 to vector<8x128xf32>
      %c0_15 = arith.constant 0 : index
      %c0_16 = arith.constant 0 : index
      %20 = vector.load %arg6[%c0_15, %c0_16] : memref<8x128xf32, #tpu.memory_space<vmem>>, vector<8x128xf32>
      tpu.vector_store %arg6[%c0_15, %c0_16], %19 {strides = array<i32>} : memref<8x128xf32, #tpu.memory_space<vmem>>, vector<8x128xf32>,
    } else {
    }
    %c0 = arith.constant 0 : index
    %c0_1 = arith.constant 0 : index
    %3 = vector.load %arg2[%c0, %c0_1] : memref<16x128xf32, #tpu.memory_space<vmem>>, vector<16x128xf32>
    %c0_2 = arith.constant 0 : index
    %c0_3 = arith.constant 0 : index
    %4 = vector.load %arg5[%c0_2, %c0_3] : memref<8x128xf32, #tpu.memory_space<vmem>>, vector<8x128xf32>
    %c0_4 = arith.constant 0 : index
    %c0_5 = arith.constant 0 : index
    %5 = vector.load %arg6[%c0_4, %c0_5] : memref<8x128xf32, #tpu.memory_space<vmem>>, vector<8x128xf32>
    %6 = vector.extract_strided_slice %3 {offsets = [0, 0], sizes = [8, 128], strides = [1, 1]} : vector<16x128xf32> to vector<8x128xf32>
    %7 = arith.minimumf %4, %6 : vector<8x128xf32>
    %8 = arith.maximumf %5, %6 : vector<8x128xf32>
    %9 = vector.extract_strided_slice %3 {offsets = [8, 0], sizes = [8, 128], strides = [1, 1]} : vector<16x128xf32> to vector<8x128xf32>
    %10 = arith.minimumf %7, %9 : vector<8x128xf32>
    %11 = arith.maximumf %8, %9 : vector<8x128xf32>
    %c0_6 = arith.constant 0 : index
    %c0_7 = arith.constant 0 : index
    %12 = vector.load %arg5[%c0_6, %c0_7] : memref<8x128xf32, #tpu.memory_space<vmem>>, vector<8x128xf32>
    tpu.vector_store %arg5[%c0_6, %c0_7], %10 {strides = array<i32>} : memref<8x128xf32, #tpu.memory_space<vmem>>, vector<8x128xf32>,
    %c0_8 = arith.constant 0 : index
    %c0_9 = arith.constant 0 : index
    %13 = vector.load %arg6[%c0_8, %c0_9] : memref<8x128xf32, #tpu.memory_space<vmem>>, vector<8x128xf32>
    tpu.vector_store %arg6[%c0_8, %c0_9], %11 {strides = array<i32>} : memref<8x128xf32, #tpu.memory_space<vmem>>, vector<8x128xf32>,
    %c0_i32_10 = arith.constant 0 : i32
    %14 = arith.cmpi eq, %arg1, %c0_i32_10 : i32
    %15 = arith.extui %14 : i1 to i32
    %c0_i32_11 = arith.constant 0 : i32
    %16 = arith.cmpi ne, %15, %c0_i32_11 : i32
    scf.if %16 {
      %c0_12 = arith.constant 0 : index
      %c0_13 = arith.constant 0 : index
      %17 = vector.load %arg5[%c0_12, %c0_13] : memref<8x128xf32, #tpu.memory_space<vmem>>, vector<8x128xf32>
      %18 = vector.shape_cast %17 : vector<8x128xf32> to vector<1x8x128xf32>
      %cst = arith.constant dense<0x7F800000> : vector<1xf32>
      %19 = vector.multi_reduction <minimumf>, %18, %cst [1, 2] : vector<1x8x128xf32> to vector<1xf32>
      %20 = vector.shape_cast %19 : vector<1xf32> to vector<1x1x1xf32>
      %21 = vector.extract %20[0, 0, 0] : f32 from vector<1x1x1xf32>
      %22 = vector.broadcast %21 : f32 to vector<1x1xf32>
      %c0_14 = arith.constant 0 : index
      %c0_15 = arith.constant 0 : index
      %23 = vector.load %arg3[%c0_14, %c0_15] : memref<1x1xf32, #tpu.memory_space<vmem>>, vector<1x1xf32>
      tpu.vector_store %arg3[%c0_14, %c0_15], %22 {strides = array<i32>} : memref<1x1xf32, #tpu.memory_space<vmem>>, vector<1x1xf32>,
      %c0_16 = arith.constant 0 : index
      %c0_17 = arith.constant 0 : index
      %24 = vector.load %arg6[%c0_16, %c0_17] : memref<8x128xf32, #tpu.memory_space<vmem>>, vector<8x128xf32>
      %25 = vector.shape_cast %24 : vector<8x128xf32> to vector<1x8x128xf32>
      %cst_18 = arith.constant dense<0xFF800000> : vector<1xf32>
      %26 = vector.multi_reduction <maximumf>, %25, %cst_18 [1, 2] : vector<1x8x128xf32> to vector<1xf32>
      %27 = vector.shape_cast %26 : vector<1xf32> to vector<1x1x1xf32>
      %28 = vector.extract %27[0, 0, 0] : f32 from vector<1x1x1xf32>
      %29 = vector.broadcast %28 : f32 to vector<1x1xf32>
      %c0_19 = arith.constant 0 : index
      %c0_20 = arith.constant 0 : index
      %30 = vector.load %arg4[%c0_19, %c0_20] : memref<1x1xf32, #tpu.memory_space<vmem>>, vector<1x1xf32>
      tpu.vector_store %arg4[%c0_19, %c0_20], %29 {strides = array<i32>} : memref<1x1xf32, #tpu.memory_space<vmem>>, vector<1x1xf32>,
    } else {
    }
    return
  }
  func.func @transform_0(%arg0: i32, %arg1: i32) -> (i32, i32) {
    %c1_i32 = arith.constant 1 : i32
    %0 = arith.muli %arg0, %c1_i32 : i32
    %1 = arith.addi %0, %arg1 : i32
    %c0_i32 = arith.constant 0 : i32
    %2 = arith.minsi %1, %c0_i32 : i32
    %c0_i32_0 = arith.constant 0 : i32
    %c0_i32_1 = arith.constant 0 : i32
    return %2, %c0_i32_0 : i32, i32
  }
  func.func @transform_1(%arg0: i32, %arg1: i32) -> (i32, i32) {
    %c0_i32 = arith.constant 0 : i32
    %c0_i32_0 = arith.constant 0 : i32
    return %arg0, %c0_i32 : i32, i32
  }
  func.func @transform_2(%arg0: i32, %arg1: i32) -> (i32, i32) {
    %c0_i32 = arith.constant 0 : i32
    %c0_i32_0 = arith.constant 0 : i32
    return %arg0, %c0_i32 : i32, i32
  }
}

</mosaic_0001>

<bundles_post_ra>
// kernel: tpu_custom_call.1
= control target key start
LH: loop header
LB: loop body
LE: loop exit
PB: predicated region body
PF: predicated region fallthrough
CT: control target
= control target key end

     0   :  { %8 = vsyncpa [#allocation5], 0  ;;  %s250_s0 = inlined_call_operand.hbm [shape: f32[16,128], index: 0, kind: input, shape index: {}]   ;;  %s251_s1 = inlined_call_operand.hbm [shape: f32[1,1], index: 1, kind: output, shape index: {0}]   ;;  %s252_s2 = inlined_call_operand.hbm [shape: f32[1,1], index: 2, kind: output, shape index: {1}]  }
   0x1   :  { %9 = vsyncpa [#allocation6], 0 }
   0x2   :  { %10 = vsyncpa [#allocation9], 0  ;;  %s192_s9 = smov [#allocation4]   ;;  %s120_s13 = scalar_lea.hbm %s250_s0, 256 }
   0x3   :  { %s22_s10 = sshll.u32 %s192_s9, 4  ;;  %p121_p0 = scmp.ne.s32.totalorder %s250_s0, %s120_s13  ;;  %s23_s10 = int_to_ptr.vmem [resolvable:$true] %s22_s10 }
   0x4   :  { %p124_p1 = scmp.lt.u32.totalorder %s120_s13, %s250_s0 }
   0x6   :  { %p126_p2 = pnand %p124_p1, %p121_p0 }
   0x8   :  { %129 = shalt.err (!%p126_p2)
}
   0x9   :  { %s130_s18 = scalar_lea.vmem %s23_s10, 256  ;;  %p135_p4 = scmp.lt.s32.totalorder %s23_s10, %s23_s10 }
   0xa   :  { %p131_p3 = scmp.ne.s32.totalorder %s23_s10, %s130_s18  ;;  %p136_p5 = scmp.lt.s32.totalorder %s130_s18, %s130_s18 }
   0xc   :  { %p137_p6 = por %p136_p5, %p135_p4 }
   0xe   :  { %p138_p7 = pnand %p137_p6, %p131_p3 }
  0x10   :  { %141 = shalt.err (!%p138_p7)
}
  0x11   :  { %s193_s19 = smov 128   ;;  %s194_s20 = smov 8  }
  0x12   :  { %28 = dma.hbm_to_vmem [thread:$0]  %s250_s0, 256, %s23_s10, [#allocation5], %s193_s19, %s193_s19, %s194_s20  }
  0x13   :  { %186 = dma.done.wait [#allocation5], 256  }
  0x14   :  { %187 = vsyncadd [#allocation5], 4294967040  ;;  %v42_v0 = vld [vmem:[#allocation4] sm:$0xff]  ;;  %v43_v1 = vld [vmem:[#allocation4 + $0x8] sm:$0xff]  ;;  %s195_s0 = smov [#allocation7]   ;;  %vm66_vm0 = vcmask 0  }
  0x15   :  { %v48_v2 = vmin.f32 %v42_v0, %v43_v1  ;;  %v49_v3 = vmax.f32 %v42_v0, %v43_v1  ;;  %s86_s23 = sshll.u32 %s195_s0, 4  ;;  %s196_s25 = smov [#allocation8]   ;;  %s87_s23 = int_to_ptr.vmem [resolvable:$true] %s86_s23 }
  0x16   :  { %s96_s26 = sshll.u32 %s196_s25, 4  ;;  %s142_s27 = scalar_lea.vmem %s87_s23, 16  ;;  %s97_s26 = int_to_ptr.vmem [resolvable:$true] %s96_s26 }
  0x17   :  { %56 = vmin.xlane.f32.xlu0 %v48_v2  ;;  %p143_p8 = scmp.ne.s32.totalorder %s87_s23, %s142_s27  ;;  %s146_s28 = scalar_lea.vmem %s87_s23, 32 }
  0x18   :  { %p147_p9 = scmp.lt.s32.totalorder %s87_s23, %s87_s23  ;;  %p148_p10 = scmp.lt.s32.totalorder %s146_s28, %s142_s27 }
  0x1a   :  { %p149_p11 = por %p148_p10, %p147_p9 }
  0x1b   :  { %69 = vmax.xlane.f32.xlu0 %v49_v3 }
  0x1c   :  { %p150_p12 = pnand %p149_p11, %p143_p8 }
  0xa4   :  { %v57_v4 = vpop.xlane.xlu0 %56 }
  0xa5   :  { %v58_v5 = vrot.slane %v57_v4, 4 }
  0xa7   :  { %v59_v6 = vmin.f32 %v57_v4, %v58_v5 }
  0xa8   :  { %v70_v7 = vpop.xlane.xlu0 %69 }
  0xa9   :  { %v60_v8 = vrot.slane %v59_v6, 2  ;;  %v71_v9 = vrot.slane %v70_v7, 4 }
  0xab   :  { %v72_v10 = vmax.f32 %v70_v7, %v71_v9  ;;  %v61_v11 = vmin.f32 %v59_v6, %v60_v8 }
  0xad   :  { %v73_v12 = vrot.slane %v72_v10, 2  ;;  %v62_v13 = vrot.slane %v61_v11, 1 }
  0xaf   :  { %v74_v14 = vmax.f32 %v72_v10, %v73_v12  ;;  %v63_v15 = vmin.f32 %v61_v11, %v62_v13 }
  0xb1   :  { %111 = vpush %v63_v15  ;;  %v75_v16 = vrot.slane %v74_v14, 1 }
  0xb3   :  { %v76_v17 = vmax.f32 %v74_v14, %v75_v16 }
  0xb5   :  { %113 = vpush %v76_v17 }
  0xe2   :  { %s112_s24 = spop %111 }
  0xe3   :  { %v65_v18 = vstv %s112_s24 }
  0xe4   :  { %67 = vst.msk [vmem:[#allocation7] sm:$0x1] %vm66_vm0, %v65_v18 }
  0xe5   :  { %153 = shalt.err (!%p150_p12)
}
  0xe6   :  { %s154_s3 = scalar_lea.hbm %s251_s1, 16 }
  0xe7   :  { %p155_p13 = scmp.ne.s32.totalorder %s251_s1, %s154_s3  ;;  %p158_p0 = scmp.lt.u32.totalorder %s154_s3, %s251_s1 }
  0xe9   :  { %p160_p1 = pnand %p158_p0, %p155_p13 }
  0xeb   :  { %163 = shalt.err (!%p160_p1)
}
  0xec   :  { %89 = dma.vmem_to_hbm [thread:$0]  %s87_s23, 16, %s251_s1, [#allocation6]  }
  0xed   :  { %s114_s10 = spop %113  ;;  %s164_s11 = scalar_lea.vmem %s97_s26, 16 }
  0xee   :  { %v78_v19 = vstv %s114_s10  ;;  %p165_p2 = scmp.ne.s32.totalorder %s97_s26, %s164_s11  ;;  %s168_s12 = scalar_lea.vmem %s97_s26, 32 }
  0xef   :  { %79 = vst.msk [vmem:[#allocation8] sm:$0x1] %vm66_vm0, %v78_v19  ;;  %p169_p3 = scmp.lt.s32.totalorder %s97_s26, %s97_s26  ;;  %p170_p4 = scmp.lt.s32.totalorder %s168_s12, %s164_s11 }
  0xf1   :  { %p171_p5 = por %p170_p4, %p169_p3 }
  0xf3   :  { %p172_p6 = pnand %p171_p5, %p165_p2 }
  0xf5   :  { %175 = shalt.err (!%p172_p6)
}
  0xf6   :  { %s176_s15 = scalar_lea.hbm %s252_s2, 16 }
  0xf7   :  { %p177_p7 = scmp.ne.s32.totalorder %s252_s2, %s176_s15  ;;  %p180_p8 = scmp.lt.u32.totalorder %s176_s15, %s252_s2 }
  0xf9   :  { %p182_p9 = pnand %p180_p8, %p177_p7 }
  0xfb   :  { %185 = shalt.err (!%p182_p9)
}
  0xfc   :  { %99 = dma.vmem_to_hbm [thread:$0]  %s97_s26, 16, %s252_s2, [#allocation9]  }
  0xfd   :  { %188 = dma.done.wait [#allocation6], 16  }
  0xfe   :  { %189 = vsyncadd [#allocation6], 4294967280 }
  0xff   :  { %190 = dma.done.wait [#allocation9], 16  }
 0x100   :  { %191 = vsyncadd [#allocation9], 4294967280 }
 0x101   :  { %106 = vsyncpa [#allocation5], 1 }
 0x102   :  { %107 = vsyncpa [#allocation6], 1 }
 0x103   :  { %108 = vsyncpa [#allocation9], 1 }

</bundles_post_ra>
